<compile_context>
chip_gen: v7x
topology: tpu7x:2x2x1
jax: 0.10.0
libtpu: 0.0.40
codegen_flags: <defaults>
</compile_context>

<pallas_src>
import jax
import jax.numpy as jnp
from jax.scipy.linalg import block_diag
from jax.experimental import pallas as pl
from jax.experimental.pallas import tpu as pltpu


def dhnn_kernel(xT_ref, w1_ref, b1_ref, w2_ref, b2_ref, w2t_ref, w3_ref,
                w13t_ref, out_ref):
    cdtype = w1_ref.dtype                     # matmul-operand dtype (f32 or bf16)

    xT = xT_ref[...]                          # (D, TB)  feature-major batch tile
    w3 = w3_ref[...]                          # (2H, 1)  f32, both nets' W3^T stacked

    # ---- fused forward (both nets at once, activations (2H, TB), f32) ----
    a1 = jnp.tanh(jnp.dot(w1_ref[...], xT,
                          preferred_element_type=jnp.float32) + b1_ref[...])
    a2 = jnp.tanh(jnp.dot(w2_ref[...], a1.astype(cdtype),
                          preferred_element_type=jnp.float32) + b2_ref[...])
    # y = W3 (a1 + a2) + b3   (never materialized; only its gradient is needed)

    # ---- hand-derived reverse pass for grad(sum(y), x), both nets fused ----
    s2 = w3 * (1.0 - a2 * a2)                                     # dL/dz2
    g_a1 = w3 + jnp.dot(w2t_ref[...], s2.astype(cdtype),
                        preferred_element_type=jnp.float32)       # dL/da1
    g_z1 = g_a1 * (1.0 - a1 * a1)                                 # dL/dz1

    # Final dot = W1d^T g_z1_d  +  rot(W1h^T) g_z1_h  ==  irr + rot  (D, TB)
    out_ref[...] = jnp.dot(w13t_ref[...], g_z1.astype(cdtype),
                           preferred_element_type=jnp.float32).astype(out_ref.dtype)


def _round_up(n, m):
    return (n + m - 1) // m * m


def init_mlp_params(key, in_dim, out_dim, hidden_dim):
    """PyTorch default nn.Linear init: U(-1/sqrt(fan_in), 1/sqrt(fan_in))."""
    def lin(k, o, i):
        kw, kb = jax.random.split(k)
        bound = 1.0 / (i ** 0.5)
        w = jax.random.uniform(kw, (o, i), jnp.float32, -bound, bound)
        b = jax.random.uniform(kb, (o,), jnp.float32, -bound, bound)
        return w, b
    k1, k2, k3 = jax.random.split(key, 3)
    w1, b1 = lin(k1, hidden_dim, in_dim)       # lin_1
    w2, b2 = lin(k2, hidden_dim, hidden_dim)   # lin_2
    w3, b3 = lin(k3, out_dim, hidden_dim)      # lin_3 (b3 has zero grad contribution)
    return (w1, b1, w2, b2, w3, b3)


def dhnn_forward(x, params_d, params_h, *, block_b=2048,
                 matmul_dtype=jnp.float32, feature_major=False):
    """DHNN.forward(x, t=None, as_separate=False) -> irr_component + rot_component.

    x is (B, D) batch-major by default; pass feature_major=True to supply (D, B)
    and receive (D, B) back (no wrapper transpose / pad passes).
    """
    if feature_major:
        D, B = x.shape
    else:
        B, D = x.shape
    assert D % 2 == 0, "input_dim must be even for the (q, p) split"
    half = D // 2

    w1d, b1d, w2d, b2d, w3d, _b3d = params_d
    w1h, b1h, w2h, b2h, w3h, _b3h = params_h
    H = w1d.shape[0]
    H2 = 2 * H

    # ---- fuse the two MLPs into single weight slabs (rows 0..H-1 = D-net,
    #      rows H..2H-1 = H-net) ----
    w1f = jnp.concatenate([w1d, w1h], axis=0)                        # (2H, D)
    b1f = jnp.concatenate([b1d, b1h])[:, None]                       # (2H, 1)
    w2f = block_diag(w2d, w2h)                                       # (2H, 2H)
    b2f = jnp.concatenate([b2d, b2h])[:, None]                       # (2H, 1)
    w2tf = block_diag(w2d.T, w2h.T)                                  # (2H, 2H)
    w3f = jnp.concatenate([w3d.reshape(-1), w3h.reshape(-1)])[:, None]  # (2H, 1)
    # Final fused weight: plain W1d^T for the D-net; for the H-net fold the
    # output rotation + sign into W1h^T:
    #   rot(W1h^T @ g) == concat([(W1h^T @ g)[half:], -(W1h^T @ g)[:half]])
    w1ht = w1h.T
    w1ht_rot = jnp.concatenate([w1ht[half:], -w1ht[:half]], axis=0)  # (D, H)
    w13tf = jnp.concatenate([w1d.T, w1ht_rot], axis=1)               # (D, 2H)

    # Matmul operands optionally bf16 (v6e/v7x MXU); biases / W3 stay f32 since
    # all elementwise + accumulation math is f32.
    w1f, w2f, w2tf, w13tf = (a.astype(matmul_dtype) for a in (w1f, w2f, w2tf, w13tf))

    # ---- feature-major batch tiling: batch on the lane (last, 128-wide) axis.
    # Large tiles amortize per-grid-step overhead; cap so the grid keeps >=2
    # tiles when possible (v7x megacore sharding of the "parallel" axis).
    B128 = _round_up(B, 128)
    tb = min(block_b, max(128, _round_up(pl.cdiv(B128, 2), 128)))
    B_pad = _round_up(B128, tb)

    src = x if feature_major else x.T
    xT = jnp.zeros((D, B_pad), matmul_dtype).at[:, :B].set(src.astype(matmul_dtype))

    itemsize = jnp.dtype(matmul_dtype).itemsize
    const2 = lambda i: (0, 0)                  # weights: resident, never re-fetched
    out_T = pl.pallas_call(
        dhnn_kernel,
        out_shape=jax.ShapeDtypeStruct((D, B_pad), jnp.float32),
        grid=(B_pad // tb,),
        in_specs=[
            pl.BlockSpec((D, tb), lambda i: (0, i)),   # x^T batch tile (pipelined)
            pl.BlockSpec((H2, D), const2),             # [W1d; W1h]
            pl.BlockSpec((H2, 1), const2),             # [b1d; b1h]
            pl.BlockSpec((H2, H2), const2),            # block_diag(W2d, W2h)
            pl.BlockSpec((H2, 1), const2),             # [b2d; b2h]
            pl.BlockSpec((H2, H2), const2),            # block_diag(W2d^T, W2h^T)
            pl.BlockSpec((H2, 1), const2),             # [W3d^T; W3h^T]
            pl.BlockSpec((D, H2), const2),             # [W1d^T | rot(W1h^T)]
        ],
        out_specs=pl.BlockSpec((D, tb), lambda i: (0, i)),
        compiler_params=pltpu.CompilerParams(
            dimension_semantics=("parallel",),         # shard batch tiles across TCs
            vmem_limit_bytes=32 * 1024 * 1024,         # fits v7x's smaller VMEM
        ),
        cost_estimate=pl.CostEstimate(
            flops=8 * B_pad * H * (D + 2 * H),         # 4 fused matmuls (fwd + bwd)
            transcendentals=4 * H * B_pad,             # two fused tanh slabs
            bytes_accessed=(D * B_pad * (itemsize + 4)
                            + (H2 * D + 2 * H2 * H2 + D * H2) * itemsize
                            + 3 * H2 * 4),
        ),
    )(xT, w1f, b1f, w2f, b2f, w2tf, w3f, w13tf)

    out_T = out_T[:, :B]
    return out_T if feature_major else out_T.T


if __name__ == "__main__":
    input_dim, hidden_dim, batch = 8, 32, 8

    key = jax.random.PRNGKey(0)
    kx, kd, kh = jax.random.split(key, 3)
    x = jax.random.normal(kx, (batch, input_dim), jnp.float32)
    params_d = init_mlp_params(kd, input_dim, 1, hidden_dim)   # mlp_d
    params_h = init_mlp_params(kh, input_dim, 1, hidden_dim)   # mlp_h

    out = jax.block_until_ready(dhnn_forward(x, params_d, params_h))

    # ---- pure-JAX autodiff reference (same semantics as torch.autograd.grad) ----
    def mlp_sum(p, xx):
        w1, b1, w2, b2, w3, b3 = p
        h = jnp.tanh(xx @ w1.T + b1)
        h = h + jnp.tanh(h @ w2.T + b2)
        return (h @ w3.T + b3).sum()

    irr = jax.grad(lambda xx: mlp_sum(params_d, xx))(x)
    g_h = jax.grad(lambda xx: mlp_sum(params_h, xx))(x)
    half = input_dim // 2
    rot = jnp.concatenate([g_h[:, half:], -g_h[:, :half]], axis=-1)
    ref = irr + rot

    assert out.shape == (batch, input_dim)
    assert jnp.allclose(out, ref, atol=1e-4, rtol=1e-4), "mismatch vs autodiff reference"

    # bf16 matmul-operand path (v6e/v7x MXU-native); f32 accumulation + f32
    # elementwise math keep the error small, but allclose needs a looser bound.
    out_bf16 = jax.block_until_ready(
        dhnn_forward(x, params_d, params_h, matmul_dtype=jnp.bfloat16))
    assert jnp.allclose(out_bf16, ref, atol=5e-2, rtol=5e-2), "bf16 path mismatch"

    print("KERNEL_OK")
</pallas_src>

<mosaic_0001>
module attributes {stable_mosaic.version = 11 : i64} {
  func.func @dhnn_kernel(%arg0: i32, %arg1: memref<8x128xf32, #tpu.memory_space<vmem>>, %arg2: memref<64x8xf32, #tpu.memory_space<vmem>>, %arg3: memref<64x1xf32, #tpu.memory_space<vmem>>, %arg4: memref<64x64xf32, #tpu.memory_space<vmem>>, %arg5: memref<64x1xf32, #tpu.memory_space<vmem>>, %arg6: memref<64x64xf32, #tpu.memory_space<vmem>>, %arg7: memref<64x1xf32, #tpu.memory_space<vmem>>, %arg8: memref<8x64xf32, #tpu.memory_space<vmem>>, %arg9: memref<8x128xf32, #tpu.memory_space<vmem>>) attributes {dimension_semantics = [#tpu.dimension_semantics<parallel>], iteration_bounds = array<i64: 1>, scalar_prefetch = 0 : i64, scratch_operands = 0 : i64, tpu.core_type = #tpu.core_type<tc>, window_params = [{transform_indices = @transform_0, window_bounds = array<i64: 8, 128>}, {pipeline_mode = #tpu.pipeline_mode<synchronous>, transform_indices = @transform_1, window_bounds = array<i64: 64, 8>}, {pipeline_mode = #tpu.pipeline_mode<synchronous>, transform_indices = @transform_2, window_bounds = array<i64: 64, 1>}, {pipeline_mode = #tpu.pipeline_mode<synchronous>, transform_indices = @transform_3, window_bounds = array<i64: 64, 64>}, {pipeline_mode = #tpu.pipeline_mode<synchronous>, transform_indices = @transform_4, window_bounds = array<i64: 64, 1>}, {pipeline_mode = #tpu.pipeline_mode<synchronous>, transform_indices = @transform_5, window_bounds = array<i64: 64, 64>}, {pipeline_mode = #tpu.pipeline_mode<synchronous>, transform_indices = @transform_6, window_bounds = array<i64: 64, 1>}, {pipeline_mode = #tpu.pipeline_mode<synchronous>, transform_indices = @transform_7, window_bounds = array<i64: 8, 64>}, {transform_indices = @transform_8, window_bounds = array<i64: 8, 128>}]} {
    %c0 = arith.constant 0 : index
    %c0_0 = arith.constant 0 : index
    %0 = vector.load %arg1[%c0, %c0_0] : memref<8x128xf32, #tpu.memory_space<vmem>>, vector<8x128xf32>
    %c0_1 = arith.constant 0 : index
    %c0_2 = arith.constant 0 : index
    %1 = vector.load %arg7[%c0_1, %c0_2] : memref<64x1xf32, #tpu.memory_space<vmem>>, vector<64x1xf32>
    %c0_3 = arith.constant 0 : index
    %c0_4 = arith.constant 0 : index
    %2 = vector.load %arg2[%c0_3, %c0_4] : memref<64x8xf32, #tpu.memory_space<vmem>>, vector<64x8xf32>
    %cst = arith.constant dense<0.000000e+00> : vector<64x128xf32>
    %3 = tpu.matmul %2, %0, %cst {dimension_numbers = #tpu.dot_dimension_numbers<[1], [0], [0], [1], [0, 0, 1, 1], [], []>} : vector<64x8xf32>, vector<8x128xf32>, vector<64x128xf32> -> vector<64x128xf32>
    %c0_5 = arith.constant 0 : index
    %c0_6 = arith.constant 0 : index
    %4 = vector.load %arg3[%c0_5, %c0_6] : memref<64x1xf32, #tpu.memory_space<vmem>>, vector<64x1xf32>
    %5 = vector.broadcast %4 : vector<64x1xf32> to vector<64x128xf32>
    %6 = arith.addf %3, %5 : vector<64x128xf32>
    %7 = math.tanh %6 : vector<64x128xf32>
    %c0_7 = arith.constant 0 : index
    %c0_8 = arith.constant 0 : index
    %8 = vector.load %arg4[%c0_7, %c0_8] : memref<64x64xf32, #tpu.memory_space<vmem>>, vector<64x64xf32>
    %cst_9 = arith.constant dense<0.000000e+00> : vector<64x128xf32>
    %9 = tpu.matmul %8, %7, %cst_9 {dimension_numbers = #tpu.dot_dimension_numbers<[1], [0], [0], [1], [0, 0, 1, 1], [], []>} : vector<64x64xf32>, vector<64x128xf32>, vector<64x128xf32> -> vector<64x128xf32>
    %c0_10 = arith.constant 0 : index
    %c0_11 = arith.constant 0 : index
    %10 = vector.load %arg5[%c0_10, %c0_11] : memref<64x1xf32, #tpu.memory_space<vmem>>, vector<64x1xf32>
    %11 = vector.broadcast %10 : vector<64x1xf32> to vector<64x128xf32>
    %12 = arith.addf %9, %11 : vector<64x128xf32>
    %13 = math.tanh %12 : vector<64x128xf32>
    %14 = arith.mulf %13, %13 : vector<64x128xf32>
    %cst_12 = arith.constant 1.000000e+00 : f32
    %15 = vector.broadcast %cst_12 : f32 to vector<64x128xf32>
    %16 = arith.subf %15, %14 : vector<64x128xf32>
    %17 = vector.broadcast %1 : vector<64x1xf32> to vector<64x128xf32>
    %18 = arith.mulf %17, %16 : vector<64x128xf32>
    %c0_13 = arith.constant 0 : index
    %c0_14 = arith.constant 0 : index
    %19 = vector.load %arg6[%c0_13, %c0_14] : memref<64x64xf32, #tpu.memory_space<vmem>>, vector<64x64xf32>
    %cst_15 = arith.constant dense<0.000000e+00> : vector<64x128xf32>
    %20 = tpu.matmul %19, %18, %cst_15 {dimension_numbers = #tpu.dot_dimension_numbers<[1], [0], [0], [1], [0, 0, 1, 1], [], []>} : vector<64x64xf32>, vector<64x128xf32>, vector<64x128xf32> -> vector<64x128xf32>
    %21 = vector.broadcast %1 : vector<64x1xf32> to vector<64x128xf32>
    %22 = arith.addf %21, %20 : vector<64x128xf32>
    %23 = arith.mulf %7, %7 : vector<64x128xf32>
    %cst_16 = arith.constant 1.000000e+00 : f32
    %24 = vector.broadcast %cst_16 : f32 to vector<64x128xf32>
    %25 = arith.subf %24, %23 : vector<64x128xf32>
    %26 = arith.mulf %22, %25 : vector<64x128xf32>
    %c0_17 = arith.constant 0 : index
    %c0_18 = arith.constant 0 : index
    %27 = vector.load %arg8[%c0_17, %c0_18] : memref<8x64xf32, #tpu.memory_space<vmem>>, vector<8x64xf32>
    %cst_19 = arith.constant dense<0.000000e+00> : vector<8x128xf32>
    %28 = tpu.matmul %27, %26, %cst_19 {dimension_numbers = #tpu.dot_dimension_numbers<[1], [0], [0], [1], [0, 0, 1, 1], [], []>} : vector<8x64xf32>, vector<64x128xf32>, vector<8x128xf32> -> vector<8x128xf32>
    %c0_20 = arith.constant 0 : index
    %c0_21 = arith.constant 0 : index
    %29 = vector.load %arg9[%c0_20, %c0_21] : memref<8x128xf32, #tpu.memory_space<vmem>>, vector<8x128xf32>
    tpu.vector_store %arg9[%c0_20, %c0_21], %28 {strides = array<i32>} : memref<8x128xf32, #tpu.memory_space<vmem>>, vector<8x128xf32>,
    return
  }
  func.func @transform_0(%arg0: i32) -> (i32, i32) {
    %c0_i32 = arith.constant 0 : i32
    %c0_i32_0 = arith.constant 0 : i32
    return %c0_i32, %arg0 : i32, i32
  }
  func.func @transform_1(%arg0: i32) -> (i32, i32) {
    %c0_i32 = arith.constant 0 : i32
    %c0_i32_0 = arith.constant 0 : i32
    %c0_i32_1 = arith.constant 0 : i32
    return %c0_i32, %c0_i32_0 : i32, i32
  }
  func.func @transform_2(%arg0: i32) -> (i32, i32) {
    %c0_i32 = arith.constant 0 : i32
    %c0_i32_0 = arith.constant 0 : i32
    %c0_i32_1 = arith.constant 0 : i32
    return %c0_i32, %c0_i32_0 : i32, i32
  }
  func.func @transform_3(%arg0: i32) -> (i32, i32) {
    %c0_i32 = arith.constant 0 : i32
    %c0_i32_0 = arith.constant 0 : i32
    %c0_i32_1 = arith.constant 0 : i32
    return %c0_i32, %c0_i32_0 : i32, i32
  }
  func.func @transform_4(%arg0: i32) -> (i32, i32) {
    %c0_i32 = arith.constant 0 : i32
    %c0_i32_0 = arith.constant 0 : i32
    %c0_i32_1 = arith.constant 0 : i32
    return %c0_i32, %c0_i32_0 : i32, i32
  }
  func.func @transform_5(%arg0: i32) -> (i32, i32) {
    %c0_i32 = arith.constant 0 : i32
    %c0_i32_0 = arith.constant 0 : i32
    %c0_i32_1 = arith.constant 0 : i32
    return %c0_i32, %c0_i32_0 : i32, i32
  }
  func.func @transform_6(%arg0: i32) -> (i32, i32) {
    %c0_i32 = arith.constant 0 : i32
    %c0_i32_0 = arith.constant 0 : i32
    %c0_i32_1 = arith.constant 0 : i32
    return %c0_i32, %c0_i32_0 : i32, i32
  }
  func.func @transform_7(%arg0: i32) -> (i32, i32) {
    %c0_i32 = arith.constant 0 : i32
    %c0_i32_0 = arith.constant 0 : i32
    %c0_i32_1 = arith.constant 0 : i32
    return %c0_i32, %c0_i32_0 : i32, i32
  }
  func.func @transform_8(%arg0: i32) -> (i32, i32) {
    %c0_i32 = arith.constant 0 : i32
    %c0_i32_0 = arith.constant 0 : i32
    return %c0_i32, %arg0 : i32, i32
  }
}

</mosaic_0001>

<bundles_post_ra>
// kernel: tpu_custom_call.1
= control target key start
LH: loop header
LB: loop body
LE: loop exit
PB: predicated region body
PF: predicated region fallthrough
CT: control target
= control target key end

     0   :  { %vm95_vm0 = vcmask 64512   ;;  %v1020_v4 = vmov 0   ;;  %s1329_s0 = inlined_call_operand.vmem [shape: f32[8,128], index: 0, kind: input, shape index: {}]   ;;  %s1330_s1 = inlined_call_operand.vmem [shape: f32[64,8], index: 1, kind: input, shape index: {}]   ;;  %s1331_s2 = inlined_call_operand.vmem [shape: f32[64,1], index: 2, kind: input, shape index: {}]   ;;  %s1332_s3 = inlined_call_operand.vmem [shape: f32[64,64], index: 3, kind: input, shape index: {}]   ;;  %s1333_s4 = inlined_call_operand.vmem [shape: f32[64,1], index: 4, kind: input, shape index: {}]   ;;  %s1334_s5 = inlined_call_operand.vmem [shape: f32[64,64], index: 5, kind: input, shape index: {}]   ;;  %s1335_s6 = inlined_call_operand.vmem [shape: f32[64,1], index: 6, kind: input, shape index: {}]   ;;  %s1336_s7 = inlined_call_operand.vmem [shape: f32[8,64], index: 7, kind: input, shape index: {}]   ;;  %s1337_s8 = inlined_call_operand.hbm [shape: f32[8,128], index: 8, kind: output, shape index: {}]  }
   0x1   :  { %v30_v0 = vld [vmem:[%s1329_s0] sm:$0xff]  ;;  %v40_v2 = vld [vmem:[%s1330_s1 + $0x8] sm:$0xff]  ;;  %v41_v3 = vld [vmem:[%s1330_s1 + $0x10] sm:$0xff]  ;;  %962 = vset.pattern.permute.xlu0 %v1020_v4  ;;  %963 = vset.pattern.permute.xlu1 %v1020_v4 }
   0x2   :  { %v39_v1 = vld [vmem:[%s1330_s1] sm:$0xff]  ;;  %824 = vmatprep.subr.mxu0 %v30_v0  ;;  %v49_v6 = vld [vmem:[%s1331_s2 + $0x10] sm:$0xff]  ;;  %v42_v7 = vld [vmem:[%s1330_s1 + $0x18] sm:$0xff] }
   0x3   :  { %826 = vmatprep.mubr.msk.f32.mxu0 %vm95_vm0, %v39_v1  ;;  %825 = vmatpush3.msra.mxu0 %v30_v0  ;;  %v47_v5 = vld [vmem:[%s1331_s2] sm:$0xff]  ;;  %v48_v9 = vld [vmem:[%s1331_s2 + $0x8] sm:$0xff]  ;;  %v50_v10 = vld [vmem:[%s1331_s2 + $0x18] sm:$0xff] }
   0x4   :  { %827 = vmatmul.mubr.msk.f32.vlgmr.msra.gmra.mrb[0].mxu0 %vm95_vm0, %v40_v2  ;;  %57 = vperm.xlu0 %962, %v47_v5   ;;  %v43_v8 = vld [vmem:[%s1330_s1 + $0x20] sm:$0xff]  ;;  %v44_v11 = vld [vmem:[%s1330_s1 + $0x28] sm:$0xff]  ;;  %v45_v12 = vld [vmem:[%s1330_s1 + $0x30] sm:$0xff] }
   0x5   :  { %829 = vmatprep.mubr.msk.f32.mxu0 %vm95_vm0, %v41_v3  ;;  %67 = vperm.xlu1 %963, %v49_v6   ;;  %v51_v13 = vld [vmem:[%s1331_s2 + $0x20] sm:$0xff]  ;;  %v52_v14 = vld [vmem:[%s1331_s2 + $0x28] sm:$0xff] }
   0x8   :  { %830 = vmatmul.mubr.msk.f32.gmra.mrb[2].mxu0 %vm95_vm0, %v42_v7  ;;  %62 = vperm.xlu0 %962, %v48_v9  }
   0x9   :  { %832 = vmatprep.mubr.msk.f32.mxu0 %vm95_vm0, %v43_v8  ;;  %72 = vperm.xlu1 %963, %v50_v10  }
   0xc   :  { %833 = vmatmul.mubr.msk.f32.gmra.mrb[4].mxu0 %vm95_vm0, %v44_v11 }
   0xd   :  { %13 = vsyncpa [#allocation3], 0  ;;  %835 = vmatprep.mubr.msk.f32.mxu0 %vm95_vm0, %v45_v12  ;;  %v46_v15 = vld [vmem:[%s1330_s1 + $0x38] sm:$0xff]  ;;  %77 = vperm.xlu0 %962, %v51_v13   ;;  %v53_v16 = vld [vmem:[%s1331_s2 + $0x30] sm:$0xff]  ;;  %vm289_vm1 = vcmask 523264   ;;  %vm1022_vm2 = vmmov 0  }
   0xe   :  { %82 = vperm.xlu1 %963, %v52_v14   ;;  %v54_v17 = vld [vmem:[%s1331_s2 + $0x38] sm:$0xff]  ;;  %v241_v18 = vld [vmem:[%s1333_s4] sm:$0xff]  ;;  %v242_v19 = vld [vmem:[%s1333_s4 + $0x8] sm:$0xff]  ;;  %s1024_s23 = smov [#allocation2]  }
   0xf   :  { %v243_v20 = vld [vmem:[%s1333_s4 + $0x10] sm:$0xff]  ;;  %v244_v21 = vld [vmem:[%s1333_s4 + $0x18] sm:$0xff]  ;;  %v245_v22 = vld [vmem:[%s1333_s4 + $0x20] sm:$0xff]  ;;  %s741_s24 = sshll.u32 %s1024_s23, 4  ;;  %s742_s24 = int_to_ptr.vmem [resolvable:$true] %s741_s24 }
  0x10   :  { %836 = vmatmul.mubr.msk.f32.gmra.mrb[6].mxu0 %vm95_vm0, %v46_v15  ;;  %v246_v23 = vld [vmem:[%s1333_s4 + $0x28] sm:$0xff]  ;;  %v247_v24 = vld [vmem:[%s1333_s4 + $0x30] sm:$0xff]  ;;  %v248_v25 = vld [vmem:[%s1333_s4 + $0x38] sm:$0xff]  ;;  %s996_s25 = scalar_lea.vmem %s742_s24, 128  ;;  %p1001_p1 = scmp.lt.s32.totalorder %s742_s24, %s742_s24 }
  0x11   :  { %87 = vperm.xlu0 %962, %v53_v16   ;;  %v31_v26 = vld [vmem:[%s1335_s6] sm:$0xff]  ;;  %v32_v27 = vld [vmem:[%s1335_s6 + $0x8] sm:$0xff]  ;;  %v33_v28 = vld [vmem:[%s1335_s6 + $0x10] sm:$0xff]  ;;  %p997_p0 = scmp.ne.s32.totalorder %s742_s24, %s996_s25  ;;  %p1002_p2 = scmp.lt.s32.totalorder %s996_s25, %s996_s25 }
  0x12   :  { %92 = vperm.xlu1 %963, %v54_v17   ;;  %v34_v29 = vld [vmem:[%s1335_s6 + $0x18] sm:$0xff]  ;;  %v35_v30 = vld [vmem:[%s1335_s6 + $0x20] sm:$0xff]  ;;  %v36_v31 = vld [vmem:[%s1335_s6 + $0x28] sm:$0xff] }
  0x13   :  { %v37_v32 = vld [vmem:[%s1335_s6 + $0x30] sm:$0xff]  ;;  %v38_v33 = vld [vmem:[%s1335_s6 + $0x38] sm:$0xff]  ;;  %v233_v34 = vld [vmem:[%s1332_s3] sm:$0xff]  ;;  %p1003_p3 = por %p1002_p2, %p1001_p1 }
  0x14   :  { %854 = vmatprep.mubr.msk.f32.mxu1 %vm289_vm1, %v233_v34  ;;  %v234_v7 = vld [vmem:[%s1332_s3 + $0x8] sm:$0xff]  ;;  %v235_v8 = vld [vmem:[%s1332_s3 + $0x10] sm:$0xff]  ;;  %v236_v9 = vld [vmem:[%s1332_s3 + $0x18] sm:$0xff] }
  0x15   :  { %251 = vperm.xlu0 %962, %v241_v18   ;;  %v237_v10 = vld [vmem:[%s1332_s3 + $0x20] sm:$0xff]  ;;  %v238_v11 = vld [vmem:[%s1332_s3 + $0x28] sm:$0xff]  ;;  %v239_v12 = vld [vmem:[%s1332_s3 + $0x30] sm:$0xff]  ;;  %p1004_p4 = pnand %p1003_p3, %p997_p0 }
  0x16   :  { %256 = vperm.xlu1 %963, %v242_v19   ;;  %v240_v13 = vld [vmem:[%s1332_s3 + $0x38] sm:$0xff]  ;;  %v491_v14 = vld [vmem:[%s1334_s5] sm:$0xff] }
  0x17   :  { %882 = vmatprep.mubr.msk.f32.mxu0 %vm289_vm1, %v491_v14 }
  0x19   :  { %261 = vperm.xlu0 %962, %v243_v20  }
  0x1a   :  { %266 = vperm.xlu1 %963, %v244_v21  }
  0x1d   :  { %271 = vperm.xlu0 %962, %v245_v22  }
  0x1e   :  { %276 = vperm.xlu1 %963, %v246_v23  }
  0x21   :  { %281 = vperm.xlu0 %962, %v247_v24  }
  0x22   :  { %286 = vperm.xlu1 %963, %v248_v25  }
  0x25   :  { %445 = vperm.xlu0 %962, %v31_v26  }
  0x26   :  { %450 = vperm.xlu1 %963, %v32_v27  }
  0x29   :  { %455 = vperm.xlu0 %962, %v33_v28  }
  0x2a   :  { %460 = vperm.xlu1 %963, %v34_v29  }
  0x2d   :  { %465 = vperm.xlu0 %962, %v35_v30  }
  0x2e   :  { %470 = vperm.xlu1 %963, %v36_v31  }
  0x31   :  { %475 = vperm.xlu0 %962, %v37_v32  }
  0x32   :  { %480 = vperm.xlu1 %963, %v38_v33  }
  0x83   :  { %v58_v35 = vpop.permute.xlu0 %57 }
  0x84   :  { %v68_v36 = vpop.permute.xlu1 %67 }
  0x87   :  { %v63_v37 = vpop.permute.xlu0 %62 }
  0x88   :  { %v73_v38 = vpop.permute.xlu1 %72 }
  0x8c   :  { %v78_v48 = vpop.permute.xlu0 %77 }
  0x8d   :  { %v83_v46 = vpop.permute.xlu1 %82 }
  0x90   :  { %v88_v56 = vpop.permute.xlu0 %87 }
  0x91   :  { %v93_v53 = vpop.permute.xlu1 %92 }
  0x94   :  { %v252_v16 = vpop.permute.xlu0 %251 }
  0x95   :  { %v257_v15 = vpop.permute.xlu1 %256 }
  0x98   :  { %v262_v18 = vpop.permute.xlu0 %261 }
  0x99   :  { %v267_v17 = vpop.permute.xlu1 %266 }
  0x9c   :  { %v272_v20 = vpop.permute.xlu0 %271 }
  0x9d   :  { %v277_v19 = vpop.permute.xlu1 %276 }
  0xa0   :  { %v282_v29 = vpop.permute.xlu0 %281 }
  0xa1   :  { %v287_v26 = vpop.permute.xlu1 %286 }
  0xd7   :  { %v828_v39 = vpop.f32.mrb[0].mxu0 }
  0xd8   :  { %v192_v40 = vadd.f32 %v828_v39, %v63_v37  ;;  %v186_v41 = vpop.f32.mrb[1].mxu0 }
  0xd9   :  { %v187_v42 = vadd.f32 %v186_v41, %v58_v35  ;;  %v1237_v35 = vpop.permute.xlu1 %450 }
  0xda   :  { %964 = vtanh.f32 %v192_v40 }
  0xdb   :  { %966 = vtanh.f32 %v187_v42  ;;  %v831_v43 = vpop.f32.mrb[2].mxu0 }
  0xdc   :  { %v202_v44 = vadd.f32 %v831_v43, %v73_v38  ;;  %v196_v45 = vpop.f32.mrb[3].mxu0 }
  0xdd   :  { %v197_v47 = vadd.f32 %v196_v45, %v68_v36  ;;  %v1239_v36 = vpop.permute.xlu0 %445 }
  0xde   :  { %968 = vtanh.f32 %v202_v44 }
  0xdf   :  { %970 = vtanh.f32 %v197_v47  ;;  %v834_v49 = vpop.f32.mrb[4].mxu0  ;;  %v1241_v47 = vpop.permute.xlu1 %460 }
  0xe0   :  { %v212_v50 = vadd.f32 %v834_v49, %v83_v46  ;;  %v206_v51 = vpop.f32.mrb[5].mxu0 }
  0xe1   :  { %v207_v52 = vadd.f32 %v206_v51, %v78_v48 }
  0xe2   :  { %972 = vtanh.f32 %v212_v50  ;;  %v1243_v50 = vpop.permute.xlu0 %455 }
  0xe3   :  { %974 = vtanh.f32 %v207_v52  ;;  %v837_v54 = vpop.f32.mrb[6].mxu0 }
  0xe4   :  { %v1181_v55 = vpop.eup %964  ;;  %v222_v57 = vadd.f32 %v837_v54, %v93_v53  ;;  %v216_v58 = vpop.f32.mrb[7].mxu0 }
  0xe5   :  { %v1183_v59 = vpop.eup %966  ;;  %v217_v60 = vadd.f32 %v216_v58, %v88_v56 }
  0xe6   :  { %976 = vtanh.f32 %v222_v57  ;;  %v913_v61 = vpack.c.bf16 %v1181_v55, %v1183_v59 }
  0xe7   :  { %978 = vtanh.f32 %v217_v60 }
  0xe8   :  { %v1187_v62 = vpop.eup %968  ;;  %914 = vmatprep.subr.bf16.mxu1 %v913_v61 }
  0xe9   :  { %v1189_v63 = vpop.eup %970  ;;  %916 = vmatpush3.bf16.msra.mxu1 %v913_v61 }
  0xea   :  { %v917_v0 = vpack.c.bf16 %v1187_v62, %v1189_v63 }
  0xec   :  { %v1193_v1 = vpop.eup %972  ;;  %918 = vmatprep.subr.bf16.mxu1 %v917_v0 }
  0xed   :  { %v1195_v2 = vpop.eup %974  ;;  %920 = vmatpush3.bf16.msra.mxu1 %v917_v0 }
  0xee   :  { %v921_v3 = vpack.c.bf16 %v1193_v1, %v1195_v2 }
  0xf0   :  { %v1199_v4 = vpop.eup %976  ;;  %922 = vmatprep.subr.bf16.mxu1 %v921_v3 }
  0xf1   :  { %v1201_v5 = vpop.eup %978  ;;  %924 = vmatpush3.bf16.msra.mxu1 %v921_v3 }
  0xf2   :  { %v925_v6 = vpack.c.bf16 %v1199_v4, %v1201_v5 }
  0xf4   :  { %926 = vmatprep.subr.bf16.mxu1 %v925_v6 }
  0xf5   :  { %928 = vmatpush3.bf16.msra.mxu1 %v925_v6  ;;  %v1248_v6 = vpop.permute.xlu1 %470 }
  0xf8   :  { %855 = vmatmul.mubr.msk.f32.vlgmr.msra.gmra.mrb[0].mxu1 %vm289_vm1, %v234_v7 }
  0xf9   :  { %857 = vmatprep.mubr.msk.f32.mxu1 %vm289_vm1, %v235_v8 }
  0xfc   :  { %858 = vmatmul.mubr.msk.f32.gmra.mrb[2].mxu1 %vm289_vm1, %v236_v9  ;;  %v1251_v9 = vpop.permute.xlu0 %465 }
  0xfd   :  { %860 = vmatprep.mubr.msk.f32.mxu1 %vm289_vm1, %v237_v10 }
 0x100   :  { %861 = vmatmul.mubr.msk.f32.gmra.mrb[4].mxu1 %vm289_vm1, %v238_v11 }
 0x101   :  { %863 = vmatprep.mubr.msk.f32.mxu1 %vm289_vm1, %v239_v12 }
 0x104   :  { %864 = vmatmul.mubr.msk.f32.gmra.mrb[6].mxu1 %vm289_vm1, %v240_v13 }
 0x1cb   :  { %v856_v21 = vpop.f32.mrb[0].mxu1 }
 0x1cc   :  { %v386_v22 = vadd.f32 %v856_v21, %v257_v15  ;;  %v380_v23 = vpop.f32.mrb[1].mxu1 }
 0x1cd   :  { %v381_v24 = vadd.f32 %v380_v23, %v252_v16  ;;  %v1257_v23 = vpop.permute.xlu0 %475 }
 0x1ce   :  { %980 = vtanh.f32 %v386_v22 }
 0x1cf   :  { %982 = vtanh.f32 %v381_v24  ;;  %v859_v25 = vpop.f32.mrb[2].mxu1 }
 0x1d0   :  { %v396_v27 = vadd.f32 %v859_v25, %v267_v17  ;;  %v390_v28 = vpop.f32.mrb[3].mxu1 }
 0x1d1   :  { %v391_v30 = vadd.f32 %v390_v28, %v262_v18  ;;  %v493_v28 = vld [vmem:[%s1334_s5 + $0x10] sm:$0xff] }
 0x1d2   :  { %984 = vtanh.f32 %v396_v27  ;;  %v492_v27 = vld [vmem:[%s1334_s5 + $0x8] sm:$0xff] }
 0x1d3   :  { %986 = vtanh.f32 %v391_v30  ;;  %v862_v31 = vpop.f32.mrb[4].mxu1  ;;  %v495_v30 = vld [vmem:[%s1334_s5 + $0x20] sm:$0xff] }
 0x1d4   :  { %v406_v32 = vadd.f32 %v862_v31, %v277_v19  ;;  %v400_v33 = vpop.f32.mrb[5].mxu1  ;;  %v496_v31 = vld [vmem:[%s1334_s5 + $0x28] sm:$0xff] }
 0x1d5   :  { %v401_v34 = vadd.f32 %v400_v33, %v272_v20  ;;  %v1255_v20 = vpop.permute.xlu1 %480  ;;  %v498_v33 = vld [vmem:[%s1334_s5 + $0x38] sm:$0xff] }
 0x1d6   :  { %988 = vtanh.f32 %v406_v32  ;;  %v497_v32 = vld [vmem:[%s1334_s5 + $0x30] sm:$0xff] }
 0x1d7   :  { %990 = vtanh.f32 %v401_v34  ;;  %v865_v37 = vpop.f32.mrb[6].mxu1  ;;  %v1021_v34 = vmov 0.0|0.0  }
 0x1d8   :  { %v981_v38 = vpop.eup %980  ;;  %v416_v39 = vadd.f32 %v865_v37, %v287_v26  ;;  %v410_v40 = vpop.f32.mrb[7].mxu1  ;;  %945 = vmatprep.subr.bf16.mxu1 %v1021_v34  ;;  %v1023_v37 = vmov 0.0  }
 0x1d9   :  { %v983_v41 = vpop.eup %982  ;;  %v428_v42 = vmul.f32 %v981_v38, %v981_v38  ;;  %v411_v43 = vadd.f32 %v410_v40, %v282_v29  ;;  %v494_v29 = vld [vmem:[%s1334_s5 + $0x18] sm:$0xff]  ;;  %910 = vmatprep.mubr.msk.f32.mxu1 %vm1022_vm2, %v1023_v37  ;;  %v637_v38 = vmul.f32 %v1181_v55, %v1181_v55 }
 0x1da   :  { %v427_v44 = vmul.f32 %v983_v41, %v983_v41  ;;  %992 = vtanh.f32 %v416_v39  ;;  %v636_v39 = vmul.f32 %v1183_v59, %v1183_v59 }
 0x1db   :  { %v436_v45 = vsub.f32 1.0, %v428_v42  ;;  %994 = vtanh.f32 %v411_v43  ;;  %v645_v42 = vsub.f32 1.0, %v637_v38 }
 0x1dc   :  { %v985_v46 = vpop.eup %984  ;;  %v435_v48 = vsub.f32 1.0, %v427_v44  ;;  %v639_v44 = vmul.f32 %v1187_v62, %v1187_v62 }
 0x1dd   :  { %v987_v49 = vpop.eup %986  ;;  %v430_v51 = vmul.f32 %v985_v46, %v985_v46  ;;  %v484_v52 = vmul.f32 %v1237_v35, %v436_v45  ;;  %v644_v46 = vsub.f32 1.0, %v636_v39 }
 0x1de   :  { %v429_v53 = vmul.f32 %v987_v49, %v987_v49  ;;  %v483_v54 = vmul.f32 %v1239_v36, %v435_v48  ;;  %v638_v48 = vmul.f32 %v1189_v63, %v1189_v63  ;;  %v647_v59 = vsub.f32 1.0, %v639_v44 }
 0x1df   :  { %v438_v56 = vsub.f32 1.0, %v430_v51 }
 0x1e0   :  { %v989_v57 = vpop.eup %988  ;;  %v437_v58 = vsub.f32 1.0, %v429_v53  ;;  %v929_v60 = vpack.c.bf16 %v484_v52, %v483_v54  ;;  %v646_v62 = vsub.f32 1.0, %v638_v48 }
 0x1e1   :  { %v991_v61 = vpop.eup %990  ;;  %v432_v0 = vmul.f32 %v989_v57, %v989_v57  ;;  %v486_v3 = vmul.f32 %v1241_v47, %v438_v56 }
 0x1e2   :  { %v431_v7 = vmul.f32 %v991_v61, %v991_v61  ;;  %930 = vmatprep.subr.bf16.mxu0 %v929_v60  ;;  %v485_v8 = vmul.f32 %v1243_v50, %v437_v58 }
 0x1e3   :  { %v440_v10 = vsub.f32 1.0, %v432_v0  ;;  %932 = vmatpush3.bf16.msra.mxu0 %v929_v60  ;;  %v643_v0 = vmul.f32 %v1199_v4, %v1199_v4 }
 0x1e4   :  { %v993_v11 = vpop.eup %992  ;;  %v439_v12 = vsub.f32 1.0, %v431_v7  ;;  %v933_v13 = vpack.c.bf16 %v486_v3, %v485_v8  ;;  %v642_v7 = vmul.f32 %v1201_v5, %v1201_v5  ;;  %v660_v5 = vld [vmem:[%s1336_s7] sm:$0xff] }
 0x1e5   :  { %v995_v14 = vpop.eup %994  ;;  %v434_v15 = vmul.f32 %v993_v11, %v993_v11  ;;  %v488_v16 = vmul.f32 %v1248_v6, %v440_v10 }
 0x1e6   :  { %v433_v17 = vmul.f32 %v995_v14, %v995_v14  ;;  %934 = vmatprep.subr.bf16.mxu0 %v933_v13  ;;  %v487_v18 = vmul.f32 %v1251_v9, %v439_v12  ;;  %v650_v4 = vsub.f32 1.0, %v642_v7 }
 0x1e7   :  { %v442_v19 = vsub.f32 1.0, %v434_v15  ;;  %936 = vmatpush3.bf16.msra.mxu0 %v933_v13 }
 0x1e8   :  { %v441_v21 = vsub.f32 1.0, %v433_v17  ;;  %v937_v22 = vpack.c.bf16 %v488_v16, %v487_v18 }
 0x1e9   :  { %v490_v24 = vmul.f32 %v1255_v20, %v442_v19 }
 0x1ea   :  { %938 = vmatprep.subr.bf16.mxu0 %v937_v22  ;;  %v489_v25 = vmul.f32 %v1257_v23, %v441_v21 }
 0x1eb   :  { %940 = vmatpush3.bf16.msra.mxu0 %v937_v22 }
 0x1ec   :  { %v941_v26 = vpack.c.bf16 %v490_v24, %v489_v25 }
 0x1ee   :  { %942 = vmatprep.subr.bf16.mxu0 %v941_v26 }
 0x1ef   :  { %944 = vmatpush3.bf16.msra.mxu0 %v941_v26 }
 0x1f2   :  { %883 = vmatmul.mubr.msk.f32.vlgmr.msra.gmra.mrb[8].mxu0 %vm289_vm1, %v492_v27 }
 0x1f3   :  { %885 = vmatprep.mubr.msk.f32.mxu0 %vm289_vm1, %v493_v28 }
 0x1f6   :  { %886 = vmatmul.mubr.msk.f32.gmra.mrb[10].mxu0 %vm289_vm1, %v494_v29 }
 0x1f7   :  { %888 = vmatprep.mubr.msk.f32.mxu0 %vm289_vm1, %v495_v30 }
 0x1fa   :  { %889 = vmatmul.mubr.msk.f32.gmra.mrb[12].mxu0 %vm289_vm1, %v496_v31 }
 0x1fb   :  { %891 = vmatprep.mubr.msk.f32.mxu0 %vm289_vm1, %v497_v32 }
 0x1fe   :  { %892 = vmatmul.mubr.msk.f32.gmra.mrb[14].mxu0 %vm289_vm1, %v498_v33 }
 0x2c5   :  { %v884_v40 = vpop.f32.mrb[8].mxu0 }
 0x2c6   :  { %v629_v41 = vadd.f32 %v884_v40, %v1237_v35  ;;  %v589_v43 = vpop.f32.mrb[9].mxu0  ;;  %v641_v35 = vmul.f32 %v1193_v1, %v1193_v1 }
 0x2c7   :  { %v628_v45 = vadd.f32 %v589_v43, %v1239_v36  ;;  %v640_v36 = vmul.f32 %v1195_v2, %v1195_v2 }
 0x2c8   :  { %v653_v49 = vmul.f32 %v645_v42, %v629_v41  ;;  %v649_v61 = vsub.f32 1.0, %v641_v35 }
 0x2c9   :  { %v652_v51 = vmul.f32 %v644_v46, %v628_v45  ;;  %v887_v55 = vpop.f32.mrb[10].mxu0 }
 0x2ca   :  { %v631_v52 = vadd.f32 %v887_v55, %v1241_v47  ;;  %v599_v53 = vpop.f32.mrb[11].mxu0 }
 0x2cb   :  { %v946_v54 = vpack.c.bf16 %v653_v49, %v652_v51  ;;  %v630_v56 = vadd.f32 %v599_v53, %v1243_v50  ;;  %v648_v50 = vsub.f32 1.0, %v640_v36 }
 0x2cc   :  { %v655_v57 = vmul.f32 %v647_v59, %v631_v52 }
 0x2cd   :  { %v654_v58 = vmul.f32 %v646_v62, %v630_v56  ;;  %v890_v63 = vpop.f32.mrb[12].mxu0  ;;  %947 = vmatpush3.bf16.msra.mxu1 %v946_v54 }
 0x2ce   :  { %v633_v60 = vadd.f32 %v890_v63, %v1248_v6  ;;  %v609_v47 = vpop.f32.mrb[13].mxu0  ;;  %948 = vmatprep.subr.bf16.mxu1 %v1021_v34  ;;  %v651_v6 = vsub.f32 1.0, %v643_v0 }
 0x2cf   :  { %v949_v1 = vpack.c.bf16 %v655_v57, %v654_v58  ;;  %v632_v3 = vadd.f32 %v609_v47, %v1251_v9 }
 0x2d0   :  { %v657_v2 = vmul.f32 %v649_v61, %v633_v60 }
 0x2d1   :  { %v656_v8 = vmul.f32 %v648_v50, %v632_v3  ;;  %v893_v10 = vpop.f32.mrb[14].mxu0  ;;  %950 = vmatpush3.bf16.msra.mxu1 %v949_v1 }
 0x2d2   :  { %v635_v11 = vadd.f32 %v893_v10, %v1255_v20  ;;  %v619_v12 = vpop.f32.mrb[15].mxu0  ;;  %951 = vmatprep.subr.bf16.mxu1 %v1021_v34 }
 0x2d3   :  { %v952_v13 = vpack.c.bf16 %v657_v2, %v656_v8  ;;  %v634_v14 = vadd.f32 %v619_v12, %v1257_v23 }
 0x2d4   :  { %v659_v15 = vmul.f32 %v651_v6, %v635_v11 }
 0x2d5   :  { %v658_v16 = vmul.f32 %v650_v4, %v634_v14  ;;  %953 = vmatpush3.bf16.msra.mxu1 %v952_v13 }
 0x2d6   :  { %954 = vmatprep.subr.bf16.mxu1 %v1021_v34 }
 0x2d7   :  { %v955_v9 = vpack.c.bf16 %v659_v15, %v658_v16 }
 0x2d9   :  { %956 = vmatpush3.bf16.msra.mxu1 %v955_v9 }
 0x2dc   :  { %911 = vmatmul.mubr.msk.f32.vlgmr.msra.gmra.mrb[8].mxu1 %vm289_vm1, %v660_v5 }
 0x3af   :  { %v730_v17 = vpop.f32.mrb[8].mxu1 }
 0x3b0   :  { %734 = vst [vmem:[#allocation2] sm:$0xff] %v730_v17  ;;  %v912_v18 = vpop.f32.mrb[9].mxu1 }
 0x3b1   :  { %1007 = shalt.err (!%p1004_p4)
}
 0x3b2   :  { %s1008_s28 = scalar_lea.hbm %s1337_s8, 128 }
 0x3b3   :  { %p1009_p5 = scmp.ne.s32.totalorder %s1337_s8, %s1008_s28  ;;  %p1012_p6 = scmp.lt.u32.totalorder %s1008_s28, %s1337_s8 }
 0x3b5   :  { %p1014_p7 = pnand %p1012_p6, %p1009_p5 }
 0x3b7   :  { %1017 = shalt.err (!%p1014_p7)
}
 0x3b8   :  { %744 = dma.vmem_to_hbm [thread:$0]  %s742_s24, 128, %s1337_s8, [#allocation3]  }
 0x3b9   :  { %1018 = dma.done.wait [#allocation3], 128  }
 0x3ba   :  { %1019 = vsyncadd [#allocation3], 4294967168 }
 0x3bb   :  { %748 = vsyncpa [#allocation3], 1 }

</bundles_post_ra>
